<compile_context>
chip_gen: v7x
topology: tpu7x:2x2x1
jax: 0.10.0
libtpu: 0.0.40
codegen_flags: <defaults>
</compile_context>

<pallas_src>
import functools

import numpy as np
import jax
import jax.numpy as jnp
from jax.experimental import pallas as pl
from jax.experimental.pallas import tpu as pltpu


def _csf_kernel(x_ref, w_ref, thr_ref, cdf_ref, set_ref, acc_ref, *, inv_l):
    # x_ref:   (1, C, TL)    one batch element, one L tile
    # w_ref:   (PQ, C)       projection weights, row p*Q+q == W[p]
    # thr_ref: (PQ, 1)       per-(projection, quantile) thresholds
    # cdf_ref: (1, PQ, 1)    resident across the L axis, written on last tile
    # set_ref: (1, PQ, TL)   lane-dense output slab
    # acc_ref: (PQ, 1) f32   running sum over L of the indicator
    li = pl.program_id(1)

    @pl.when(li == 0)
    def _init():
        acc_ref[...] = jnp.zeros_like(acc_ref)

    # conv1d with kernel size 1 == channel matmul on the MXU.
    a = jnp.dot(w_ref[...], x_ref[0],
                preferred_element_type=jnp.float32,
                precision=jax.lax.Precision.HIGHEST)          # (PQ, TL)

    indicator = (a < thr_ref[...]).astype(jnp.float32)        # (PQ, TL)
    set_ref[0] = indicator.astype(set_ref.dtype)
    acc_ref[...] += jnp.sum(indicator, axis=-1, keepdims=True)

    @pl.when(li == pl.num_programs(1) - 1)
    def _finalize():
        cdf_ref[0] = acc_ref[...] * inv_l                      # mean over true L


def _vmem_capacity_bytes():
    try:
        return int(pltpu.get_tpu_info().vmem_capacity_bytes)
    except Exception:
        return 64 * 1024 * 1024   # conservative fallback: v7x per-core VMEM


def _pick_tile_l(L, C, PQ, set_itemsize, budget_bytes):
    """Largest multiple-of-128 divisor of L whose working set fits the budget."""
    def working_set(tl):
        # double-buffered x + set tiles, plus resident weights/thresholds/scratch
        return (2 * (C * tl * 4 + PQ * tl * set_itemsize)
                + PQ * C * 4 + PQ * 4 * 128 * 2)

    cands = [d for d in range(128, L + 1, 128) if L % d == 0]
    for tl in sorted(cands, reverse=True):
        if working_set(tl) <= budget_bytes:
            return tl, working_set(tl)
    if cands:                        # nothing fits the budget: smallest lane-dense tile
        return cands[0], working_set(cands[0])
    # L < 128 or no multiple-of-128 divisor: single full-L tile.
    # TODO(synk): ragged-tail masking for huge L with no 128-multiple divisor.
    return L, working_set(L)


def cumulative_set_features(X, W, min_vals, max_vals, n_quantiles,
                            set_dtype=jnp.float32):
    """X: (B, C, L) f32, W: (P, C) f32 -> (cdf (B, P*Q) f32, set (B, P*Q, L))."""
    B, C, L = map(int, X.shape)
    P = int(W.shape[0])
    Q = int(n_quantiles)
    PQ = P * Q

    # threshold[p, q] = min[p] + (max[p] - min[p]) * (q + 1) / (Q + 1)
    qfrac = jnp.arange(1, Q + 1, dtype=jnp.float32) / jnp.float32(Q + 1)
    thr = min_vals[:, None] + (max_vals - min_vals)[:, None] * qfrac[None, :]  # (P, Q)
    thr_flat = thr.reshape(PQ, 1).astype(jnp.float32)          # row p*Q+q, matches torch
    W_rep = jnp.repeat(W.astype(jnp.float32), Q, axis=0)       # (PQ, C)

    set_itemsize = jnp.dtype(set_dtype).itemsize
    vmem_cap = _vmem_capacity_bytes()
    tl, working_set = _pick_tile_l(L, C, PQ, set_itemsize,
                                   budget_bytes=int(vmem_cap * 0.40))
    n_l = L // tl
    vmem_limit = min(int(vmem_cap * 0.75),
                     max(working_set + (4 << 20), 32 << 20))

    cost = pl.CostEstimate(
        flops=2 * B * PQ * C * L,
        transcendentals=0,
        bytes_accessed=(B * (C * L * 4 + PQ * L * set_itemsize + PQ * 4)
                        + PQ * C * 4 + PQ * 4),
    )

    kernel = functools.partial(_csf_kernel, inv_l=float(1.0 / L))

    cdf3, set_out = pl.pallas_call(
        kernel,
        out_shape=(
            jax.ShapeDtypeStruct((B, PQ, 1), jnp.float32),
            jax.ShapeDtypeStruct((B, PQ, L), set_dtype),
        ),
        grid=(B, n_l),
        in_specs=[
            pl.BlockSpec((1, C, tl), lambda b, l: (b, 0, l)),
            pl.BlockSpec((PQ, C), lambda b, l: (0, 0)),
            pl.BlockSpec((PQ, 1), lambda b, l: (0, 0)),
        ],
        out_specs=(
            pl.BlockSpec((1, PQ, 1), lambda b, l: (b, 0, 0)),
            pl.BlockSpec((1, PQ, tl), lambda b, l: (b, 0, l)),
        ),
        scratch_shapes=[pltpu.VMEM((PQ, 1), jnp.float32)],
        compiler_params=pltpu.CompilerParams(
            dimension_semantics=("parallel", "arbitrary"),
            vmem_limit_bytes=vmem_limit,
        ),
        cost_estimate=cost,
    )(X.astype(jnp.float32), W_rep, thr_flat)

    # (B, PQ, 1) -> (B, PQ); the set output is already in the torch layout.
    return cdf3.reshape(B, PQ), set_out


def fit(X, W):
    # Mirrors CumulativeSetFeatures.fit (plain-JAX glue, not a hot path).
    # TODO(synk): torch.quantile kept outside the Pallas kernel (sort-based op).
    a = jnp.einsum('pc,bcl->blp', W, X,
                   precision=jax.lax.Precision.HIGHEST)        # (B, L, P)
    a = a.reshape(-1, W.shape[0])
    min_vals = jnp.quantile(a, 0.01, axis=0)
    max_vals = jnp.quantile(a, 0.99, axis=0)
    return min_vals.astype(jnp.float32), max_vals.astype(jnp.float32)


if __name__ == "__main__":
    key = jax.random.PRNGKey(0)
    B, C, L = 2, 4, 16          # batch, n_channels, sequence length
    P, Q = 8, 5                 # n_projections, n_quantiles (small demo sizes)

    k_x, k_w = jax.random.split(key)
    X = jax.random.normal(k_x, (B, C, L), dtype=jnp.float32)
    # projections has shape (n_projections, n_channels, 1); kernel-size-1 -> (P, C)
    projections = jax.random.normal(k_w, (P, C, 1), dtype=jnp.float32)
    W = projections[:, :, 0]

    min_vals, max_vals = fit(X, W)

    cdf, set_out = cumulative_set_features(X, W, min_vals, max_vals, Q)
    jax.block_until_ready((cdf, set_out))

    # Pure-JAX reference of the forward pass for a sanity check.
    a_ref = jnp.einsum('pc,bcl->bpl', W, X, precision=jax.lax.Precision.HIGHEST)
    qf = jnp.arange(1, Q + 1, dtype=jnp.float32) / jnp.float32(Q + 1)
    thr = min_vals[:, None] + (max_vals - min_vals)[:, None] * qf[None, :]
    set_ref = (a_ref[:, :, None, :] < thr[None, :, :, None]).astype(jnp.float32)
    cdf_ref = set_ref.mean(-1).reshape(B, P * Q)
    set_ref = set_ref.reshape(B, P * Q, L)

    assert cdf.shape == (B, P * Q) and cdf.dtype == jnp.float32
    assert set_out.shape == (B, P * Q, L) and set_out.dtype == jnp.float32
    # Tolerant checks (a comparison can only flip on exact-threshold ties).
    assert float(np.mean(np.abs(np.asarray(set_out) - np.asarray(set_ref)))) < 1e-3
    assert np.allclose(np.asarray(cdf), np.asarray(cdf_ref), atol=1e-2)

    print("KERNEL_OK")
</pallas_src>

<mosaic_0001>
module attributes {stable_mosaic.version = 11 : i64} {
  func.func @_csf_kernel(%arg0: i32, %arg1: i32, %arg2: memref<1x4x16xf32, #tpu.memory_space<vmem>>, %arg3: memref<40x4xf32, #tpu.memory_space<vmem>>, %arg4: memref<40x1xf32, #tpu.memory_space<vmem>>, %arg5: memref<1x40x1xf32, #tpu.memory_space<vmem>>, %arg6: memref<1x40x16xf32, #tpu.memory_space<vmem>>, %arg7: memref<40x1xf32, #tpu.memory_space<vmem>>) attributes {dimension_semantics = [#tpu.dimension_semantics<parallel>, #tpu.dimension_semantics<arbitrary>], iteration_bounds = array<i64: 2, 1>, scalar_prefetch = 0 : i64, scratch_operands = 1 : i64, tpu.core_type = #tpu.core_type<tc>, window_params = [{transform_indices = @transform_0, window_bounds = array<i64: 1, 4, 16>}, {pipeline_mode = #tpu.pipeline_mode<synchronous>, transform_indices = @transform_1, window_bounds = array<i64: 40, 4>}, {pipeline_mode = #tpu.pipeline_mode<synchronous>, transform_indices = @transform_2, window_bounds = array<i64: 40, 1>}, {transform_indices = @transform_3, window_bounds = array<i64: 1, 40, 1>}, {transform_indices = @transform_4, window_bounds = array<i64: 1, 40, 16>}]} {
    %c0_i32 = arith.constant 0 : i32
    %0 = arith.cmpi eq, %arg1, %c0_i32 : i32
    %1 = arith.extui %0 : i1 to i32
    %c0_i32_0 = arith.constant 0 : i32
    %2 = arith.cmpi ne, %1, %c0_i32_0 : i32
    scf.if %2 {
      %cst_17 = arith.constant 0.000000e+00 : f32
      %23 = vector.broadcast %cst_17 : f32 to vector<40x1xf32>
      %c0_18 = arith.constant 0 : index
      %c0_19 = arith.constant 0 : index
      %24 = vector.load %arg7[%c0_18, %c0_19] : memref<40x1xf32, #tpu.memory_space<vmem>>, vector<40x1xf32>
      tpu.vector_store %arg7[%c0_18, %c0_19], %23 {strides = array<i32>} : memref<40x1xf32, #tpu.memory_space<vmem>>, vector<40x1xf32>,
    } else {
    }
    %c0 = arith.constant 0 : index
    %c0_1 = arith.constant 0 : index
    %3 = vector.load %arg3[%c0, %c0_1] : memref<40x4xf32, #tpu.memory_space<vmem>>, vector<40x4xf32>
    %c0_2 = arith.constant 0 : index
    %c0_3 = arith.constant 0 : index
    %c0_4 = arith.constant 0 : index
    %4 = vector.load %arg2[%c0_2, %c0_3, %c0_4] : memref<1x4x16xf32, #tpu.memory_space<vmem>>, vector<1x4x16xf32>
    %5 = vector.shape_cast %4 : vector<1x4x16xf32> to vector<4x16xf32>
    %cst = arith.constant dense<0.000000e+00> : vector<40x16xf32>
    %6 = tpu.matmul %3, %5, %cst {dimension_numbers = #tpu.dot_dimension_numbers<[1], [0], [0], [1], [0, 0, 1, 1], [], []>, precision = #tpu.contract_precision<fp32>} : vector<40x4xf32>, vector<4x16xf32>, vector<40x16xf32> -> vector<40x16xf32>
    %c0_5 = arith.constant 0 : index
    %c0_6 = arith.constant 0 : index
    %7 = vector.load %arg4[%c0_5, %c0_6] : memref<40x1xf32, #tpu.memory_space<vmem>>, vector<40x1xf32>
    %8 = vector.broadcast %7 : vector<40x1xf32> to vector<40x16xf32>
    %9 = arith.cmpf olt, %6, %8 : vector<40x16xf32>
    %10 = arith.extui %9 : vector<40x16xi1> to vector<40x16xi32>
    %11 = arith.sitofp %10 : vector<40x16xi32> to vector<40x16xf32>
    %c0_7 = arith.constant 0 : index
    %c0_8 = arith.constant 0 : index
    %c0_9 = arith.constant 0 : index
    %12 = vector.load %arg6[%c0_7, %c0_8, %c0_9] : memref<1x40x16xf32, #tpu.memory_space<vmem>>, vector<1x40x16xf32>
    %13 = vector.shape_cast %12 : vector<1x40x16xf32> to vector<40x16xf32>
    %14 = vector.shape_cast %11 : vector<40x16xf32> to vector<1x40x16xf32>
    tpu.vector_store %arg6[%c0_7, %c0_8, %c0_9], %14 {strides = array<i32>} : memref<1x40x16xf32, #tpu.memory_space<vmem>>, vector<1x40x16xf32>,
    %c0_10 = arith.constant 0 : index
    %c0_11 = arith.constant 0 : index
    %15 = vector.load %arg7[%c0_10, %c0_11] : memref<40x1xf32, #tpu.memory_space<vmem>>, vector<40x1xf32>
    %cst_12 = arith.constant dense<0.000000e+00> : vector<40xf32>
    %16 = vector.multi_reduction <add>, %11, %cst_12 [1] : vector<40x16xf32> to vector<40xf32>
    %17 = vector.shape_cast %16 : vector<40xf32> to vector<40x1xf32>
    %18 = arith.addf %15, %17 : vector<40x1xf32>
    %c0_13 = arith.constant 0 : index
    %c0_14 = arith.constant 0 : index
    %19 = vector.load %arg7[%c0_13, %c0_14] : memref<40x1xf32, #tpu.memory_space<vmem>>, vector<40x1xf32>
    tpu.vector_store %arg7[%c0_13, %c0_14], %18 {strides = array<i32>} : memref<40x1xf32, #tpu.memory_space<vmem>>, vector<40x1xf32>,
    %c0_i32_15 = arith.constant 0 : i32
    %20 = arith.cmpi eq, %arg1, %c0_i32_15 : i32
    %21 = arith.extui %20 : i1 to i32
    %c0_i32_16 = arith.constant 0 : i32
    %22 = arith.cmpi ne, %21, %c0_i32_16 : i32
    scf.if %22 {
      %c0_17 = arith.constant 0 : index
      %c0_18 = arith.constant 0 : index
      %23 = vector.load %arg7[%c0_17, %c0_18] : memref<40x1xf32, #tpu.memory_space<vmem>>, vector<40x1xf32>
      %cst_19 = arith.constant 6.250000e-02 : f32
      %24 = vector.broadcast %cst_19 : f32 to vector<40x1xf32>
      %25 = arith.mulf %23, %24 : vector<40x1xf32>
      %c0_20 = arith.constant 0 : index
      %c0_21 = arith.constant 0 : index
      %c0_22 = arith.constant 0 : index
      %26 = vector.load %arg5[%c0_20, %c0_21, %c0_22] : memref<1x40x1xf32, #tpu.memory_space<vmem>>, vector<1x40x1xf32>
      %27 = vector.shape_cast %26 : vector<1x40x1xf32> to vector<40x1xf32>
      %28 = vector.shape_cast %25 : vector<40x1xf32> to vector<1x40x1xf32>
      tpu.vector_store %arg5[%c0_20, %c0_21, %c0_22], %28 {strides = array<i32>} : memref<1x40x1xf32, #tpu.memory_space<vmem>>, vector<1x40x1xf32>,
    } else {
    }
    return
  }
  func.func @transform_0(%arg0: i32, %arg1: i32) -> (i32, i32, i32) {
    %c0_i32 = arith.constant 0 : i32
    %c0_i32_0 = arith.constant 0 : i32
    return %arg0, %c0_i32, %arg1 : i32, i32, i32
  }
  func.func @transform_1(%arg0: i32, %arg1: i32) -> (i32, i32) {
    %c0_i32 = arith.constant 0 : i32
    %c0_i32_0 = arith.constant 0 : i32
    %c0_i32_1 = arith.constant 0 : i32
    return %c0_i32, %c0_i32_0 : i32, i32
  }
  func.func @transform_2(%arg0: i32, %arg1: i32) -> (i32, i32) {
    %c0_i32 = arith.constant 0 : i32
    %c0_i32_0 = arith.constant 0 : i32
    %c0_i32_1 = arith.constant 0 : i32
    return %c0_i32, %c0_i32_0 : i32, i32
  }
  func.func @transform_3(%arg0: i32, %arg1: i32) -> (i32, i32, i32) {
    %c0_i32 = arith.constant 0 : i32
    %c0_i32_0 = arith.constant 0 : i32
    %c0_i32_1 = arith.constant 0 : i32
    return %arg0, %c0_i32, %c0_i32_0 : i32, i32, i32
  }
  func.func @transform_4(%arg0: i32, %arg1: i32) -> (i32, i32, i32) {
    %c0_i32 = arith.constant 0 : i32
    %c0_i32_0 = arith.constant 0 : i32
    return %arg0, %c0_i32, %arg1 : i32, i32, i32
  }
}

</mosaic_0001>

<bundles_post_ra>
// kernel: tpu_custom_call.1
= control target key start
LH: loop header
LB: loop body
LE: loop exit
PB: predicated region body
PF: predicated region fallthrough
CT: control target
= control target key end

     0   :  { %s1386_s15 = smov 0   ;;  %s1388_s16 = smov 0   ;;  %s1628_s0 = inlined_call_operand.vmem [shape: f32[2,4,16], index: 0, kind: input, shape index: {}]   ;;  %s1629_s1 = inlined_call_operand.vmem [shape: f32[40,4], index: 1, kind: input, shape index: {}]   ;;  %s1630_s2 = inlined_call_operand.vmem [shape: f32[40,1], index: 2, kind: input, shape index: {}]   ;;  %s1631_s3 = inlined_call_operand.vmem [shape: f32[2,40,1], index: 3, kind: output, shape index: {0}]   ;;  %s1632_s4 = inlined_call_operand.vmem [shape: f32[2,40,16], index: 4, kind: output, shape index: {1}]  }
   0x1   :  { %s1390_s17 = smov 0  }
   0x2 LB: > { %s27_s18 = sadd.s32 1, %s1352_s16  ;;  %p1110_p0 = scmp.ge.s32.totalorder %s1356_s17, 1  ;;  %s1356_s17 = sphi %s1390_s17, %s15_s17   ;;  %s1352_s16 = sphi %s1388_s16, %s1634_s16   ;;  %s1348_s15 = sphi %s1386_s15, %s1633_s15  }
   0x3   : > { %p29_p1 = scmp.ge.s32.totalorder %s27_s18, 2  ;;  %p183_p2 = scmp.lt.s32.totalorder %s1356_s17, 3 }
   0x5   : > { %s1636_s18 = smov (%p29_p1, %s27_s18), 0  ;;  %p184_p3 = pnand %p1110_p0, %p183_p2 }
   0x6   : > { %p219_p4 = scmp.lt.s32.totalorder (!%p184_p3), %s1348_s15, 1  ;;  %v249_v0 = vld [vmem:[%s1629_s1] sm:$0xff] (!%p184_p3)  ;;  %vm255_vm0 = vcmask (!%p184_p3), 31744   ;;  %v1358_v1 = vmov (!%p184_p3), 0.0   ;;  %v250_v3 = vld [vmem:[%s1629_s1 + $0x8] sm:$0xff] (!%p184_p3)  ;;  %v251_v4 = vld [vmem:[%s1629_s1 + $0x10] sm:$0xff] (!%p184_p3) }
   0x7   : > { %187 = sbr.rel (%p184_p3) target bundleno = 451 (0x1c3), region = 32  ;;  %1208 = vmatprep.subr.mxu0 (!%p184_p3), %v1358_v1  ;;  %1157 = vmatprep.subr.mxu1 (!%p184_p3), %v1358_v1  ;;  %v257_v2 = vsel (!%p184_p3), %vm255_vm0, %v249_v0, 0  ;;  %v252_v5 = vld [vmem:[%s1629_s1 + $0x18] sm:$0xff] (!%p184_p3)  ;;  %vm1359_vm1 = vmmov (!%p184_p3), 0   ;;  %v260_v7 = vsel (!%p184_p3), %vm255_vm0, %v250_v3, 0  ;;  %v263_v8 = vsel (!%p184_p3), %vm255_vm0, %v251_v4, 0 }
   0x8   : > { %1210 = vmatprep.mubr.msk.f32.mxu0 (!%p184_p3), %vm1359_vm1, %v1358_v1  ;;  %1159 = vmatprep.mubr.msk.f32.mxu1 (!%p184_p3), %vm1359_vm1, %v1358_v1  ;;  %v1425_v6 = vand.u32 (!%p184_p3), 4294901760, %v257_v2  ;;  %v266_v9 = vsel (!%p184_p3), %vm255_vm0, %v252_v5, 0  ;;  %v253_v10 = vld [vmem:[%s1629_s1 + $0x20] sm:$0xff] (!%p184_p3)  ;;  %v1433_v11 = vand.u32 (!%p184_p3), 4294901760, %v260_v7  ;;  %v1435_v12 = vand.u32 (!%p184_p3), 4294901760, %v263_v8  ;;  %v895_v18 = vld [vmem:[%s1630_s2 + $0x10] sm:$0xff] (!%p184_p3) }
   0x9   : > { %v1360_v13 = vmov (!%p184_p3), 0   ;;  %v893_v14 = vld [vmem:[%s1630_s2] sm:$0xff] (!%p184_p3)  ;;  %vm271_vm2 = vcmask (!%p184_p3), 1043456   ;;  %v1444_v16 = vand.u32 (!%p184_p3), 4294901760, %v266_v9  ;;  %v269_v17 = vsel (!%p184_p3), %vm255_vm0, %v253_v10, 0  ;;  %v894_v21 = vld [vmem:[%s1630_s2 + $0x8] sm:$0xff] (!%p184_p3) }
   0xa   : > { %1332 = vset.pattern.permute.xlu0 (!%p184_p3), %v1360_v13  ;;  %1333 = vset.pattern.permute.xlu1 (!%p184_p3), %v1360_v13  ;;  %v1442_v15 = vsub.f32 (!%p184_p3), %v257_v2, %v1425_v6  ;;  %v1454_v19 = vsub.f32 (!%p184_p3), %v260_v7, %v1433_v11  ;;  %v1457_v20 = vsub.f32 (!%p184_p3), %v263_v8, %v1435_v12  ;;  %v896_v24 = vld [vmem:[%s1630_s2 + $0x18] sm:$0xff] (!%p184_p3)  ;;  %v1467_v27 = vand.u32 (!%p184_p3), 4294901760, %v269_v17  ;;  %v897_v36 = vld [vmem:[%s1630_s2 + $0x20] sm:$0xff] (!%p184_p3) }
   0xb   : > { %900 = vperm.xlu0 (!%p184_p3), %1332, %v893_v14   ;;  %910 = vperm.xlu1 (!%p184_p3), %1333, %v895_v18   ;;  %v1472_v31 = vsub.f32 (!%p184_p3), %v266_v9, %v1444_v16  ;;  %vm243_vm3 = vcmask (!%p184_p3), 7168   ;;  %vm938_vm4 = vcmask (!%p184_p3), 130048  }
   0xc   : > { %v343_v23 = vand.u32 (!%p184_p3), 4294901760, %v1442_v15  ;;  %v353_v26 = vand.u32 (!%p184_p3), 4294901760, %v1454_v19  ;;  %v363_v30 = vand.u32 (!%p184_p3), 4294901760, %v1457_v20  ;;  %v1477_v35 = vsub.f32 (!%p184_p3), %v269_v17, %v1467_v27  ;;  %244 = vst.msk [vmem:[#allocation2] sm:$0xff] (!%p184_p3), %vm243_vm3, %v1358_v1  ;;  %245 = vst.msk [vmem:[#allocation2 + $0x8] sm:$0xff] (!%p184_p3), %vm243_vm3, %v1358_v1 }
   0xd   : > { %v373_v40 = vand.u32 (!%p184_p3), 4294901760, %v1472_v31  ;;  %246 = vst.msk [vmem:[#allocation2 + $0x10] sm:$0xff] (!%p184_p3), %vm243_vm3, %v1358_v1  ;;  %247 = vst.msk [vmem:[#allocation2 + $0x18] sm:$0xff] (!%p184_p3), %vm243_vm3, %v1358_v1 }
   0xe   : > { %s1638_s15 = smov (!%p219_p4, %s1348_s15), 1  ;;  %v344_v29 = vsub.f32 %v1442_v15, %v343_v23  ;;  %v354_v32 = vsub.f32 %v1454_v19, %v353_v26  ;;  %v364_v39 = vsub.f32 %v1457_v20, %v363_v30  ;;  %v383_v45 = vand.u32 4294901760, %v1477_v35  ;;  %248 = vst.msk [vmem:[#allocation2 + $0x20] sm:$0xff] %vm243_vm3, %v1358_v1 }
   0xf   : > { %s1111_s5 = sshll.u32 %s1638_s15, 2  ;;  %905 = vperm.xlu0 %1332, %v894_v21   ;;  %915 = vperm.xlu1 %1333, %v896_v24   ;;  %v374_v44 = vsub.f32 %v1472_v31, %v373_v40  ;;  %s1304_s21 = smul.u32 40, %s1638_s15 }
  0x10   : > { %s225_s10 = scalar_lea.vmem %s1628_s0, %s1111_s5  ;;  %v345_v34 = vand.u32 4294901760, %v344_v29  ;;  %v355_v37 = vand.u32 4294901760, %v354_v32  ;;  %v365_v43 = vand.u32 4294901760, %v364_v39  ;;  %v384_v47 = vsub.f32 %v1477_v35, %v383_v45 }
  0x11   : > { %v254_v22 = vld [vmem:[%s225_s10] sm:$0xf]  ;;  %v375_v46 = vand.u32 4294901760, %v374_v44  ;;  %s1582_s24 = scalar_lea.vmem %s1632_s4, %s1304_s21  ;;  %s230_s27 = scalar_lea.vmem %s1631_s3, %s1304_s21 }
  0x12   : > { %v273_v25 = vsel %vm271_vm2, %v254_v22, 0  ;;  %v385_v48 = vand.u32 4294901760, %v384_v47 }
  0x13   : > { %v276_v28 = vand.u32 4294901760, %v273_v25  ;;  %920 = vperm.xlu0 %1332, %v897_v36   ;;  %v945_v29 = vld [vmem:[#allocation2 + $0x8] sm:$0xff] }
  0x14   : > { %v946_v32 = vld [vmem:[#allocation2 + $0x10] sm:$0xff] }
  0x15   : > { %v393_v33 = vsub.f32 %v273_v25, %v276_v28  ;;  %1209 = vmatpush3.msra.mxu0 %v276_v28  ;;  %1158 = vmatpush3.msra.mxu1 %v276_v28 }
  0x16   : > { %1211 = vmatmul.mubr.f32.vlgmr.msra.gmra.mrb[0].mxu0 %v343_v23  ;;  %1174 = vmatprep.subr.mxu1 %v1358_v1 }
  0x17   : > { %1160 = vmatmul.mubr.f32.vlgmr.msra.gmra.mrb[0].mxu1 %v345_v34  ;;  %1213 = vmatprep.mubr.msk.f32.mxu0 %vm1359_vm1, %v1358_v1  ;;  %v394_v38 = vand.u32 4294901760, %v393_v33 }
  0x18   : > { %1162 = vmatprep.mubr.msk.f32.mxu1 %vm1359_vm1, %v1358_v1  ;;  %1225 = vmatprep.subr.mxu0 %v1358_v1 }
  0x19   : > { %v395_v41 = vsub.f32 %v393_v33, %v394_v38  ;;  %1226 = vmatpush3.msra.mxu0 %v394_v38 }
  0x1a   : > { %1214 = vmatmul.mubr.f32.gmra.mrb[2].mxu0 %v353_v26  ;;  %1242 = vmatprep.subr.mxu0 %v1358_v1  ;;  %v944_v26 = vld [vmem:[#allocation2] sm:$0xff] }
  0x1b   : > { %1163 = vmatmul.mubr.f32.gmra.mrb[2].mxu1 %v355_v37  ;;  %v396_v42 = vand.u32 4294901760, %v395_v41  ;;  %1216 = vmatprep.mubr.msk.f32.mxu0 %vm1359_vm1, %v1358_v1 }
  0x1c   : > { %1165 = vmatprep.mubr.msk.f32.mxu1 %vm1359_vm1, %v1358_v1 }
  0x1d   : > { %1175 = vmatpush3.msra.mxu1 %v396_v42 }
  0x1e   : > { %1217 = vmatmul.mubr.f32.gmra.mrb[4].mxu0 %v363_v30  ;;  %1191 = vmatprep.subr.mxu1 %v1358_v1 }
  0x1f   : > { %1166 = vmatmul.mubr.f32.gmra.mrb[4].mxu1 %v365_v43  ;;  %1219 = vmatprep.mubr.msk.f32.mxu0 %vm1359_vm1, %v1358_v1 }
  0x20   : > { %1168 = vmatprep.mubr.msk.f32.mxu1 %vm1359_vm1, %v1358_v1 }
  0x22   : > { %1220 = vmatmul.mubr.f32.gmra.mrb[6].mxu0 %v373_v40  ;;  %v948_v40 = vld [vmem:[#allocation2 + $0x20] sm:$0xff] }
  0x23   : > { %1169 = vmatmul.mubr.f32.gmra.mrb[6].mxu1 %v375_v46  ;;  %1222 = vmatprep.mubr.msk.f32.mxu0 %vm1359_vm1, %v1358_v1 }
  0x24   : > { %1171 = vmatprep.mubr.msk.f32.mxu1 %vm1359_vm1, %v1358_v1 }
  0x26   : > { %1223 = vmatmul.mubr.f32.gmra.mrb[8].mxu0 %v383_v45 }
  0x27   : > { %1172 = vmatmul.mubr.f32.gmra.mrb[8].mxu1 %v385_v48  ;;  %1227 = vmatprep.mubr.msk.f32.mxu0 %vm1359_vm1, %v1358_v1 }
  0x28   : > { %1176 = vmatprep.mubr.msk.f32.mxu1 %vm1359_vm1, %v1358_v1 }
  0x2a   : > { %1228 = vmatmul.mubr.f32.vlgmr.msra.gmra.mrb[0].mxu0 %v1425_v6 }
  0x2b   : > { %1177 = vmatmul.mubr.f32.vlgmr.msra.gmra.mrb[0].mxu1 %v1425_v6  ;;  %1230 = vmatprep.mubr.msk.f32.mxu0 %vm1359_vm1, %v1358_v1 }
  0x2c   : > { %1179 = vmatprep.mubr.msk.f32.mxu1 %vm1359_vm1, %v1358_v1  ;;  %1192 = vmatpush3.msra.mxu1 %v393_v33 }
  0x2d   : > { %1243 = vmatpush3.msra.mxu0 %v276_v28 }
  0x2e   : > { %1231 = vmatmul.mubr.f32.gmra.mrb[2].mxu0 %v1433_v11 }
  0x2f   : > { %1180 = vmatmul.mubr.f32.gmra.mrb[2].mxu1 %v1433_v11  ;;  %1233 = vmatprep.mubr.msk.f32.mxu0 %vm1359_vm1, %v1358_v1 }
  0x30   : > { %1182 = vmatprep.mubr.msk.f32.mxu1 %vm1359_vm1, %v1358_v1 }
  0x32   : > { %1234 = vmatmul.mubr.f32.gmra.mrb[4].mxu0 %v1435_v12 }
  0x33   : > { %1183 = vmatmul.mubr.f32.gmra.mrb[4].mxu1 %v1435_v12  ;;  %1236 = vmatprep.mubr.msk.f32.mxu0 %vm1359_vm1, %v1358_v1 }
  0x34   : > { %1185 = vmatprep.mubr.msk.f32.mxu1 %vm1359_vm1, %v1358_v1 }
  0x36   : > { %1237 = vmatmul.mubr.f32.gmra.mrb[6].mxu0 %v1444_v16 }
  0x37   : > { %1186 = vmatmul.mubr.f32.gmra.mrb[6].mxu1 %v1444_v16  ;;  %1239 = vmatprep.mubr.msk.f32.mxu0 %vm1359_vm1, %v1358_v1 }
  0x38   : > { %1188 = vmatprep.mubr.msk.f32.mxu1 %vm1359_vm1, %v1358_v1 }
  0x3a   : > { %1240 = vmatmul.mubr.f32.gmra.mrb[8].mxu0 %v1467_v27 }
  0x3b   : > { %1189 = vmatmul.mubr.f32.gmra.mrb[8].mxu1 %v1467_v27  ;;  %1244 = vmatprep.mubr.msk.f32.mxu0 %vm1359_vm1, %v1358_v1 }
  0x3c   : > { %1193 = vmatprep.mubr.msk.f32.mxu1 %vm1359_vm1, %v1358_v1 }
  0x3e   : > { %1245 = vmatmul.mubr.f32.vlgmr.msra.gmra.mrb[0].mxu0 %v1425_v6 }
  0x3f   : > { %1194 = vmatmul.mubr.f32.vlgmr.msra.gmra.mrb[0].mxu1 %v1442_v15  ;;  %1247 = vmatprep.mubr.msk.f32.mxu0 %vm1359_vm1, %v1358_v1 }
  0x40   : > { %1196 = vmatprep.mubr.msk.f32.mxu1 %vm1359_vm1, %v1358_v1 }
  0x42   : > { %1248 = vmatmul.mubr.f32.gmra.mrb[2].mxu0 %v1433_v11 }
  0x43   : > { %1197 = vmatmul.mubr.f32.gmra.mrb[2].mxu1 %v1454_v19  ;;  %1250 = vmatprep.mubr.msk.f32.mxu0 %vm1359_vm1, %v1358_v1 }
  0x44   : > { %1199 = vmatprep.mubr.msk.f32.mxu1 %vm1359_vm1, %v1358_v1 }
  0x46   : > { %1251 = vmatmul.mubr.f32.gmra.mrb[4].mxu0 %v1435_v12 }
  0x47   : > { %1200 = vmatmul.mubr.f32.gmra.mrb[4].mxu1 %v1457_v20  ;;  %1253 = vmatprep.mubr.msk.f32.mxu0 %vm1359_vm1, %v1358_v1 }
  0x48   : > { %1202 = vmatprep.mubr.msk.f32.mxu1 %vm1359_vm1, %v1358_v1 }
  0x4a   : > { %1254 = vmatmul.mubr.f32.gmra.mrb[6].mxu0 %v1444_v16 }
  0x4b   : > { %1203 = vmatmul.mubr.f32.gmra.mrb[6].mxu1 %v1472_v31  ;;  %1256 = vmatprep.mubr.msk.f32.mxu0 %vm1359_vm1, %v1358_v1 }
  0x4c   : > { %1205 = vmatprep.mubr.msk.f32.mxu1 %vm1359_vm1, %v1358_v1 }
  0x4e   : > { %1257 = vmatmul.mubr.f32.gmra.mrb[8].mxu0 %v1467_v27 }
  0x4f   : > { %1206 = vmatmul.mubr.f32.gmra.mrb[8].mxu1 %v1477_v35  ;;  %v947_v35 = vld [vmem:[#allocation2 + $0x18] sm:$0xff] }
  0x8a   : > { %v901_v50 = vpop.permute.xlu0 %900  ;;  %v911_v62 = vpop.permute.xlu1 %910 }
  0x8e   : > { %v906_v63 = vpop.permute.xlu0 %905  ;;  %v916_v9 = vpop.permute.xlu1 %915 }
  0x92   : > { %v921_v23 = vpop.permute.xlu0 %920 }
 0x111   : > { %v865_v49 = vpop.f32.mrb[0].mxu0 }
 0x112   : > { %v561_v51 = vpop.f32.mrb[0].mxu1  ;;  %v1246_v52 = vpop.f32.mrb[1].mxu0 }
 0x113   : > { %v1259_v53 = vadd.f32 %v865_v49, %v561_v51  ;;  %v1195_v54 = vpop.f32.mrb[1].mxu1 }
 0x115   : > { %vm923_vm5 = vcmp.lt.f32.partialorder %v1259_v53, %v901_v50  ;;  %v871_v55 = vpop.f32.mrb[2].mxu0 }
 0x116   : > { %v568_v56 = vpop.f32.mrb[2].mxu1  ;;  %v1249_v57 = vpop.f32.mrb[3].mxu0  ;;  %v1114_v58 = vsel %vm923_vm5, 1.0, %v1358_v1 }
 0x117   : > { %v1260_v59 = vadd.f32 %v871_v55, %v568_v56  ;;  %v1198_v60 = vpop.f32.mrb[3].mxu1  ;;  %v949_v61 = vsel %vm938_vm4, %v1114_v58, 0.0  ;;  %939 = vst.msk [vmem:[%s1582_s24] sm:$0xff] %vm938_vm4, %v1114_v58 }
 0x118   : > { %950 = vadd.xlane.f32.xlu1 %v949_v61 }
 0x119   : > { %vm924_vm6 = vcmp.lt.f32.partialorder %v1260_v59, %v906_v63  ;;  %v877_v0 = vpop.f32.mrb[4].mxu0 }
 0x11a   : > { %v575_v2 = vpop.f32.mrb[4].mxu1  ;;  %v1252_v3 = vpop.f32.mrb[5].mxu0  ;;  %v1115_v4 = vsel %vm924_vm6, 1.0, %v1358_v1 }
 0x11b   : > { %v1261_v5 = vadd.f32 %v877_v0, %v575_v2  ;;  %v1201_v6 = vpop.f32.mrb[5].mxu1  ;;  %v952_v7 = vsel %vm938_vm4, %v1115_v4, 0.0  ;;  %940 = vst.msk [vmem:[%s1582_s24 + $0x8] sm:$0xff] %vm938_vm4, %v1115_v4 }
 0x11c   : > { %953 = vadd.xlane.f32.xlu0 %v952_v7 }
 0x11d   : > { %vm925_vm7 = vcmp.lt.f32.partialorder %v1261_v5, %v911_v62  ;;  %v883_v8 = vpop.f32.mrb[6].mxu0 }
 0x11e   : > { %v582_v10 = vpop.f32.mrb[6].mxu1  ;;  %v1255_v11 = vpop.f32.mrb[7].mxu0  ;;  %v1116_v12 = vsel %vm925_vm7, 1.0, %v1358_v1 }
 0x11f   : > { %v1262_v13 = vadd.f32 %v883_v8, %v582_v10  ;;  %v1204_v14 = vpop.f32.mrb[7].mxu1  ;;  %v955_v15 = vsel %vm938_vm4, %v1116_v12, 0.0  ;;  %941 = vst.msk [vmem:[%s1582_s24 + $0x10] sm:$0xff] %vm938_vm4, %v1116_v12 }
 0x120   : > { %956 = vadd.xlane.f32.xlu0 %v955_v15 }
 0x121   : > { %vm926_vm8 = vcmp.lt.f32.partialorder %v1262_v13, %v916_v9  ;;  %v889_v16 = vpop.f32.mrb[8].mxu0 }
 0x122   : > { %v589_v17 = vpop.f32.mrb[8].mxu1  ;;  %v1258_v18 = vpop.f32.mrb[9].mxu0  ;;  %v1117_v19 = vsel %vm926_vm8, 1.0, %v1358_v1 }
 0x123   : > { %v1263_v20 = vadd.f32 %v889_v16, %v589_v17  ;;  %v1207_v21 = vpop.f32.mrb[9].mxu1  ;;  %v958_v22 = vsel %vm938_vm4, %v1117_v19, 0.0  ;;  %942 = vst.msk [vmem:[%s1582_s24 + $0x18] sm:$0xff] %vm938_vm4, %v1117_v19 }
 0x124   : > { %959 = vadd.xlane.f32.xlu1 %v958_v22 }
 0x125   : > { %vm927_vm9 = vcmp.lt.f32.partialorder %v1263_v20, %v921_v23 }
 0x126   : > { %v1118_v24 = vsel %vm927_vm9, 1.0, %v1358_v1 }
 0x127   : > { %v961_v25 = vsel %vm938_vm4, %v1118_v24, 0.0  ;;  %943 = vst.msk [vmem:[%s1582_s24 + $0x20] sm:$0xff] %vm938_vm4, %v1118_v24 }
 0x128   : > { %962 = vadd.xlane.f32.xlu0 %v961_v25 }
 0x1a5   : > { %v951_v27 = vpop.xlane.xlu1 %950 }
 0x1a6   : > { %v964_v28 = vadd.f32 %v951_v27, %v944_v26 }
 0x1a8   : > { %970 = vst.msk [vmem:[#allocation2] sm:$0xff] %vm243_vm3, %v964_v28 }
 0x1a9   : > { %v954_v30 = vpop.xlane.xlu0 %953 }
 0x1aa   : > { %v965_v31 = vadd.f32 %v954_v30, %v945_v29 }
 0x1ac   : > { %971 = vst.msk [vmem:[#allocation2 + $0x8] sm:$0xff] %vm243_vm3, %v965_v31 }
 0x1ad   : > { %v957_v33 = vpop.xlane.xlu0 %956 }
 0x1ae   : > { %v966_v34 = vadd.f32 %v957_v33, %v946_v32 }
 0x1af   : > { %v978_v1 = vld [vmem:[#allocation2] sm:$0xff] }
 0x1b0   : > { %v983_v36 = vmul.f32 0.0625, %v978_v1  ;;  %972 = vst.msk [vmem:[#allocation2 + $0x10] sm:$0xff] %vm243_vm3, %v966_v34 }
 0x1b1   : > { %v960_v37 = vpop.xlane.xlu1 %959 }
 0x1b2   : > { %988 = vst.msk [vmem:[%s230_s27] sm:$0xff] %vm243_vm3, %v983_v36  ;;  %v967_v38 = vadd.f32 %v960_v37, %v947_v35 }
 0x1b3   : > { %v979_v39 = vld [vmem:[#allocation2 + $0x8] sm:$0xff] }
 0x1b4   : > { %v984_v41 = vmul.f32 0.0625, %v979_v39  ;;  %973 = vst.msk [vmem:[#allocation2 + $0x18] sm:$0xff] %vm243_vm3, %v967_v38 }
 0x1b5   : > { %v963_v42 = vpop.xlane.xlu0 %962 }
 0x1b6   : > { %989 = vst.msk [vmem:[%s230_s27 + $0x8] sm:$0xff] %vm243_vm3, %v984_v41  ;;  %v968_v43 = vadd.f32 %v963_v42, %v948_v40 }
 0x1b7   : > { %v980_v44 = vld [vmem:[#allocation2 + $0x10] sm:$0xff] }
 0x1b8   : > { %v985_v45 = vmul.f32 0.0625, %v980_v44  ;;  %974 = vst.msk [vmem:[#allocation2 + $0x20] sm:$0xff] %vm243_vm3, %v968_v43 }
 0x1ba   : > { %990 = vst.msk [vmem:[%s230_s27 + $0x10] sm:$0xff] %vm243_vm3, %v985_v45 }
 0x1bb   : > { %v981_v46 = vld [vmem:[#allocation2 + $0x18] sm:$0xff] }
 0x1bc   : > { %v986_v47 = vmul.f32 0.0625, %v981_v46 }
 0x1be   : > { %991 = vst.msk [vmem:[%s230_s27 + $0x18] sm:$0xff] %vm243_vm3, %v986_v47 }
 0x1bf   : > { %v982_v48 = vld [vmem:[#allocation2 + $0x20] sm:$0xff] }
 0x1c0   : > { %v987_v49 = vmul.f32 0.0625, %v982_v48 }
 0x1c2   : > { %992 = vst.msk [vmem:[%s230_s27 + $0x20] sm:$0xff] %vm243_vm3, %v987_v49 }
 0x1c3 PF: > { %s15_s17 = sadd.s32 1, %s1356_s17   ;;  %s1633_s15 = smov %s1352_s16 }
 0x1c4   : > { %p12_p5 = scmp.ge.s32.totalorder %s15_s17, 4   ;;  %s1634_s16 = smov %s1636_s18 }
 0x1c6   :  { %14 = sbr.rel (!%p12_p5) target bundleno = 2 (0x2), region = 82 }

</bundles_post_ra>
